<compile_context>
chip_gen: v6e
topology: v6e:2x2x1
jax: 0.10.0
libtpu: 0.0.40
codegen_flags: <defaults>
</compile_context>

<pallas_src>
import functools

import jax
import jax.numpy as jnp
from jax.experimental import pallas as pl
from jax.experimental.pallas import tpu as pltpu


# VMEM budget for the double-buffered x + out blocks (4 blocks in flight).
_BLOCK_BUDGET_BYTES = 24 * 1024 * 1024
# Explicit scoped-VMEM limit (avoid the 32 MiB default silently capping depth).
_VMEM_LIMIT_BYTES = 40 * 1024 * 1024


def _se_kernel(x_ref, w1t_ref, b1_ref, w2t_ref, b2_ref, o_ref, *, inv_hw):
    # x_ref: (Bn, C, HW)   w1t_ref: (C, Cr)   b1_ref: (1, Cr)
    # w2t_ref: (Cr, C)     b2_ref: (1, C)     o_ref: (Bn, C, HW)
    x = x_ref[...]                                           # (Bn, C, HW) f32

    # Global average pool over spatial dims (AdaptiveAvgPool2d(1)).
    pooled = jnp.sum(x, axis=2) * inv_hw                     # (Bn, C)

    # conv1 (1x1): C -> C//r, + bias, ReLU.
    s = jnp.dot(pooled, w1t_ref[...],
                preferred_element_type=jnp.float32) + b1_ref[...]   # (Bn, Cr)
    s = jnp.maximum(s, 0.0)

    # conv2 (1x1): C//r -> C, + bias, Hardsigmoid ((t+3)/6 clamped to [0,1]).
    t = jnp.dot(s, w2t_ref[...],
                preferred_element_type=jnp.float32) + b2_ref[...]   # (Bn, C)
    scale = jnp.clip(t * (1.0 / 6.0) + 0.5, 0.0, 1.0)                # (Bn, C)

    # Broadcast per-channel scale over spatial and multiply with identity.
    o_ref[...] = x * scale[:, :, None]


@jax.jit
def se_module(x_nchw, w1, b1, w2, b2):
    """x_nchw: (N, C, H, W) float32.
    w1: (Cr, C), b1: (Cr,), w2: (C, Cr), b2: (C,)  -- 1x1 conv weights squeezed.
    Returns (N, C, H, W) float32."""
    N, C, H, W = x_nchw.shape
    Cr = w1.shape[0]
    HW = H * W

    # Contiguous reshape -> no HBM copy.
    x = x_nchw.reshape(N, C, HW)

    # Batch block size against the double-buffered in+out VMEM budget.
    per_n_bytes = C * HW * 4                       # one batch row of one block
    bn_max = max(1, _BLOCK_BUDGET_BYTES // (4 * per_n_bytes))
    if N >= 2:
        # Keep at least 2 grid steps so v7x's two TensorCores both get work.
        Bn = max(1, min(bn_max, -(-N // 2)))
    else:
        Bn = 1
    grid = pl.cdiv(N, Bn)   # partial last block handled by Pallas masking

    w1t = w1.T                        # (C, Cr)
    w2t = w2.T                        # (Cr, C)
    b1_2d = b1.reshape(1, Cr)
    b2_2d = b2.reshape(1, C)

    kernel = functools.partial(_se_kernel, inv_hw=1.0 / HW)

    out = pl.pallas_call(
        kernel,
        out_shape=jax.ShapeDtypeStruct((N, C, HW), jnp.float32),
        grid_spec=pltpu.PrefetchScalarGridSpec(
            num_scalar_prefetch=0,
            grid=(grid,),
            in_specs=[
                pl.BlockSpec((Bn, C, HW), lambda n: (n, 0, 0)),
                pl.BlockSpec((C, Cr), lambda n: (0, 0)),
                pl.BlockSpec((1, Cr), lambda n: (0, 0)),
                pl.BlockSpec((Cr, C), lambda n: (0, 0)),
                pl.BlockSpec((1, C), lambda n: (0, 0)),
            ],
            out_specs=pl.BlockSpec((Bn, C, HW), lambda n: (n, 0, 0)),
        ),
        compiler_params=pltpu.CompilerParams(
            dimension_semantics=("parallel",),
            vmem_limit_bytes=_VMEM_LIMIT_BYTES,
        ),
    )(x, w1t, b1_2d, w2t, b2_2d)

    # Contiguous reshape back -> no HBM copy.
    return out.reshape(N, C, H, W)


def se_module_ref(x, w1, b1, w2, b2):
    """Pure-JAX reference matching the PyTorch SEModule forward."""
    pooled = jnp.mean(x, axis=(2, 3))                        # (N, C)
    s = jnp.maximum(pooled @ w1.T + b1, 0.0)                 # (N, Cr)
    t = s @ w2.T + b2                                        # (N, C)
    scale = jnp.clip(t / 6.0 + 0.5, 0.0, 1.0)                # (N, C)
    return x * scale[:, :, None, None]


if __name__ == "__main__":
    key = jax.random.PRNGKey(0)

    def make_case(k, N, C, H, W, reduction=4):
        Cr = C // reduction
        k_x, k_w1, k_b1, k_w2, k_b2 = jax.random.split(k, 5)
        x = jax.random.normal(k_x, (N, C, H, W), dtype=jnp.float32)
        w1 = 0.1 * jax.random.normal(k_w1, (Cr, C), dtype=jnp.float32)
        b1 = 0.1 * jax.random.normal(k_b1, (Cr,), dtype=jnp.float32)
        w2 = 0.1 * jax.random.normal(k_w2, (C, Cr), dtype=jnp.float32)
        b2 = 0.1 * jax.random.normal(k_b2, (C,), dtype=jnp.float32)
        return x, w1, b1, w2, b2

    k1, k2 = jax.random.split(key)
    # Case 1: lane-aligned spatial (HW = 256), even batch (divisible grid).
    case1 = make_case(k1, 2, 16, 16, 16)
    # Case 2: PP-LCNet-like ragged spatial (HW = 49), odd batch (partial
    # last batch block exercises Pallas boundary masking).
    case2 = make_case(k2, 3, 24, 7, 7)

    for args in (case1, case2):
        out = jax.block_until_ready(se_module(*args))
        ref = se_module_ref(*args)
        assert out.shape == ref.shape
        err = float(jnp.max(jnp.abs(out - ref)))
        assert jnp.allclose(out, ref, atol=1e-5, rtol=1e-5), err

    print("KERNEL_OK")
</pallas_src>

<mosaic_0001>
module attributes {stable_mosaic.version = 11 : i64} {
  func.func @_se_kernel(%arg0: i32, %arg1: memref<1x16x256xf32, #tpu.memory_space<vmem>>, %arg2: memref<16x4xf32, #tpu.memory_space<vmem>>, %arg3: memref<1x4xf32, #tpu.memory_space<vmem>>, %arg4: memref<4x16xf32, #tpu.memory_space<vmem>>, %arg5: memref<1x16xf32, #tpu.memory_space<vmem>>, %arg6: memref<1x16x256xf32, #tpu.memory_space<vmem>>) attributes {dimension_semantics = [#tpu.dimension_semantics<parallel>], iteration_bounds = array<i64: 2>, scalar_prefetch = 0 : i64, scratch_operands = 0 : i64, tpu.core_type = #tpu.core_type<tc>, window_params = [{transform_indices = @transform_0, window_bounds = array<i64: 1, 16, 256>}, {pipeline_mode = #tpu.pipeline_mode<synchronous>, transform_indices = @transform_1, window_bounds = array<i64: 16, 4>}, {pipeline_mode = #tpu.pipeline_mode<synchronous>, transform_indices = @transform_2, window_bounds = array<i64: 1, 4>}, {pipeline_mode = #tpu.pipeline_mode<synchronous>, transform_indices = @transform_3, window_bounds = array<i64: 4, 16>}, {pipeline_mode = #tpu.pipeline_mode<synchronous>, transform_indices = @transform_4, window_bounds = array<i64: 1, 16>}, {transform_indices = @transform_5, window_bounds = array<i64: 1, 16, 256>}]} {
    %c0 = arith.constant 0 : index
    %c0_0 = arith.constant 0 : index
    %c0_1 = arith.constant 0 : index
    %0 = vector.load %arg1[%c0, %c0_0, %c0_1] : memref<1x16x256xf32, #tpu.memory_space<vmem>>, vector<1x16x256xf32>
    %cst = arith.constant dense<0.000000e+00> : vector<1x16xf32>
    %1 = vector.multi_reduction <add>, %0, %cst [2] : vector<1x16x256xf32> to vector<1x16xf32>
    %cst_2 = arith.constant 3.906250e-03 : f32
    %2 = vector.broadcast %cst_2 : f32 to vector<1x16xf32>
    %3 = arith.mulf %1, %2 : vector<1x16xf32>
    %c0_3 = arith.constant 0 : index
    %c0_4 = arith.constant 0 : index
    %4 = vector.load %arg2[%c0_3, %c0_4] : memref<16x4xf32, #tpu.memory_space<vmem>>, vector<16x4xf32>
    %cst_5 = arith.constant dense<0.000000e+00> : vector<1x4xf32>
    %5 = tpu.matmul %3, %4, %cst_5 {dimension_numbers = #tpu.dot_dimension_numbers<[1], [0], [0], [1], [0, 0, 1, 1], [], []>} : vector<1x16xf32>, vector<16x4xf32>, vector<1x4xf32> -> vector<1x4xf32>
    %c0_6 = arith.constant 0 : index
    %c0_7 = arith.constant 0 : index
    %6 = vector.load %arg3[%c0_6, %c0_7] : memref<1x4xf32, #tpu.memory_space<vmem>>, vector<1x4xf32>
    %7 = arith.addf %5, %6 : vector<1x4xf32>
    %cst_8 = arith.constant 0.000000e+00 : f32
    %8 = vector.broadcast %cst_8 : f32 to vector<1x4xf32>
    %9 = arith.maximumf %7, %8 : vector<1x4xf32>
    %c0_9 = arith.constant 0 : index
    %c0_10 = arith.constant 0 : index
    %10 = vector.load %arg4[%c0_9, %c0_10] : memref<4x16xf32, #tpu.memory_space<vmem>>, vector<4x16xf32>
    %cst_11 = arith.constant dense<0.000000e+00> : vector<1x16xf32>
    %11 = tpu.matmul %9, %10, %cst_11 {dimension_numbers = #tpu.dot_dimension_numbers<[1], [0], [0], [1], [0, 0, 1, 1], [], []>} : vector<1x4xf32>, vector<4x16xf32>, vector<1x16xf32> -> vector<1x16xf32>
    %c0_12 = arith.constant 0 : index
    %c0_13 = arith.constant 0 : index
    %12 = vector.load %arg5[%c0_12, %c0_13] : memref<1x16xf32, #tpu.memory_space<vmem>>, vector<1x16xf32>
    %13 = arith.addf %11, %12 : vector<1x16xf32>
    %cst_14 = arith.constant 0.166666672 : f32
    %14 = vector.broadcast %cst_14 : f32 to vector<1x16xf32>
    %15 = arith.mulf %13, %14 : vector<1x16xf32>
    %cst_15 = arith.constant 5.000000e-01 : f32
    %16 = vector.broadcast %cst_15 : f32 to vector<1x16xf32>
    %17 = arith.addf %15, %16 : vector<1x16xf32>
    %cst_16 = arith.constant 0.000000e+00 : f32
    %cst_17 = arith.constant 1.000000e+00 : f32
    %18 = vector.broadcast %cst_16 : f32 to vector<1x16xf32>
    %19 = arith.maximumf %18, %17 : vector<1x16xf32>
    %20 = vector.broadcast %cst_17 : f32 to vector<1x16xf32>
    %21 = arith.minimumf %20, %19 : vector<1x16xf32>
    %22 = vector.shape_cast %21 : vector<1x16xf32> to vector<1x16x1xf32>
    %23 = vector.broadcast %22 : vector<1x16x1xf32> to vector<1x16x256xf32>
    %24 = arith.mulf %0, %23 : vector<1x16x256xf32>
    %c0_18 = arith.constant 0 : index
    %c0_19 = arith.constant 0 : index
    %c0_20 = arith.constant 0 : index
    %25 = vector.load %arg6[%c0_18, %c0_19, %c0_20] : memref<1x16x256xf32, #tpu.memory_space<vmem>>, vector<1x16x256xf32>
    tpu.vector_store %arg6[%c0_18, %c0_19, %c0_20], %24 {strides = array<i32>} : memref<1x16x256xf32, #tpu.memory_space<vmem>>, vector<1x16x256xf32>,
    return
  }
  func.func @transform_0(%arg0: i32) -> (i32, i32, i32) {
    %c0_i32 = arith.constant 0 : i32
    %c0_i32_0 = arith.constant 0 : i32
    %c0_i32_1 = arith.constant 0 : i32
    return %arg0, %c0_i32, %c0_i32_0 : i32, i32, i32
  }
  func.func @transform_1(%arg0: i32) -> (i32, i32) {
    %c0_i32 = arith.constant 0 : i32
    %c0_i32_0 = arith.constant 0 : i32
    %c0_i32_1 = arith.constant 0 : i32
    return %c0_i32, %c0_i32_0 : i32, i32
  }
  func.func @transform_2(%arg0: i32) -> (i32, i32) {
    %c0_i32 = arith.constant 0 : i32
    %c0_i32_0 = arith.constant 0 : i32
    %c0_i32_1 = arith.constant 0 : i32
    return %c0_i32, %c0_i32_0 : i32, i32
  }
  func.func @transform_3(%arg0: i32) -> (i32, i32) {
    %c0_i32 = arith.constant 0 : i32
    %c0_i32_0 = arith.constant 0 : i32
    %c0_i32_1 = arith.constant 0 : i32
    return %c0_i32, %c0_i32_0 : i32, i32
  }
  func.func @transform_4(%arg0: i32) -> (i32, i32) {
    %c0_i32 = arith.constant 0 : i32
    %c0_i32_0 = arith.constant 0 : i32
    %c0_i32_1 = arith.constant 0 : i32
    return %c0_i32, %c0_i32_0 : i32, i32
  }
  func.func @transform_5(%arg0: i32) -> (i32, i32, i32) {
    %c0_i32 = arith.constant 0 : i32
    %c0_i32_0 = arith.constant 0 : i32
    %c0_i32_1 = arith.constant 0 : i32
    return %arg0, %c0_i32, %c0_i32_0 : i32, i32, i32
  }
}

</mosaic_0001>

<bundles_post_ra>
// kernel: se_module.1
= control target key start
LH: loop header
LB: loop body
LE: loop exit
PB: predicated region body
PF: predicated region fallthrough
CT: control target
= control target key end

     0   :  { %s570_s18 = smov 0   ;;  %s609_s0 = inlined_call_operand.vmem [shape: f32[2,16,256], index: 0, kind: input, shape index: {}]   ;;  %s610_s1 = inlined_call_operand.vmem [shape: f32[16,4], index: 1, kind: input, shape index: {}]   ;;  %s611_s2 = inlined_call_operand.vmem [shape: f32[1,4], index: 2, kind: input, shape index: {}]   ;;  %s612_s3 = inlined_call_operand.vmem [shape: f32[4,16], index: 3, kind: input, shape index: {}]   ;;  %s613_s4 = inlined_call_operand.vmem [shape: f32[1,16], index: 4, kind: input, shape index: {}]   ;;  %s614_s5 = inlined_call_operand.vmem [shape: f32[2,16,256], index: 5, kind: output, shape index: {}]  }
   0x1 LB: > { %s487_s19 = sadd.s32 4294967295, %s536_s18   ;;  %p491_p0 = scmp.ge.s32.totalorder %s536_s18, 1  ;;  %s536_s18 = sphi %s570_s18, %s15_s18  }
   0x2   : > { %p187_p1 = scmp.lt.s32.totalorder %s536_s18, 3 }
   0x4   : > { %p188_p2 = pnand %p491_p0, %p187_p1 }
   0x5   : > { %p215_p3 = scmp.lt.s32.totalorder (!%p188_p2), %s487_s19, 1 }
   0x6   : > { %191 = sbr.rel (%p188_p2) target bundleno = 688 (0x2b0), region = 40 }
   0xb   : > { %s616_s19 = smov (!%p215_p3, %s487_s19), 1  ;;  %v538_v6 = vmov 0.0   ;;  %v238_v7 = vld [vmem:[%s610_s1 + $0x8] sm:$0xff]  ;;  %v237_v8 = vld [vmem:[%s610_s1] sm:$0xff]  ;;  %vm539_vm0 = vmmov 0   ;;  %v242_v9 = vlaneseq  ;;  %vm253_vm1 = vcmask 130112  }
   0xc   : > { %s501_s20 = sshll.u32 %s616_s19, 5  ;;  %508 = vmatprep.subr.mxu0 %v538_v6  ;;  %515 = vmatprep.subr.mxu1 %v538_v6  ;;  %vm255_vm2 = vcmask 130048   ;;  %v329_v22 = vld [vmem:[%s612_s3] sm:$0xf]  ;;  %vm335_vm3 = vcmask 1043456   ;;  %vm331_vm4 = vcmask 31744  }
   0xd   : > { %s219_s23 = scalar_lea.vmem %s609_s0, %s501_s20  ;;  %509 = vmatpush3.msra.mxu0 %v238_v7  ;;  %512 = vmatprep.mubr.msk.f32.mxu0 %vm539_vm0, %v538_v6  ;;  %v243_v10 = vand.u32 127, %v242_v9  ;;  %v245_v11 = vshrl.u32 %v242_v9, 7  ;;  %v239_v23 = vld [vmem:[%s611_s2] sm:$0x1]  ;;  %s224_s11 = scalar_lea.vmem %s614_s5, %s501_s20 }
   0xe   : > { %v225_v0 = vld [vmem:[%s219_s23] sm:$0xff]  ;;  %v226_v1 = vld [vmem:[%s219_s23 + $0x8] sm:$0xff]  ;;  %v227_v2 = vld [vmem:[%s219_s23 + $0x10] sm:$0xff]  ;;  %510 = vmatprep.subr.mxu0 %v538_v6  ;;  %517 = vmatprep.mubr.msk.f32.mxu1 %vm539_vm0, %v538_v6 }
   0xf   : > { %v229_v3 = vadd.f32 %v226_v1, %v225_v0  ;;  %v228_v4 = vld [vmem:[%s219_s23 + $0x18] sm:$0xff]  ;;  %511 = vmatpush3.msra.mxu0 %v237_v8  ;;  %v248_v12 = vadd.s32 4294967288, %v243_v10  ;;  %v246_v14 = vsub.s32 %v243_v10, %v245_v11  ;;  %516 = vmatpush3.msk.msra.mxu1 %vm335_vm3, %v329_v22  ;;  %v330_v28 = vld [vmem:[%s613_s4] sm:$0x1]  ;;  %v415_v35 = vsub.s32 0, %v245_v11 }
  0x10   : > { %v232_v5 = vadd.f32 %v228_v4, %v227_v2 }
  0x11   : > { %230 = vadd.xlane.f32.xlu0 %v229_v3  ;;  %v251_v16 = vsub.s32 %v248_v12, %v245_v11 }
  0x15   : > { %233 = vadd.xlane.f32.xlu0 %v232_v5 }
  0x9a   : > { %v231_v13 = vpop.xlane.xlu0 %230 }
  0x9b   : > { %v235_v15 = vmul.f32 0.00390625, %v231_v13 }
  0x9d   : > { %v247_v19 = vrot.slane %v235_v15, %v246_v14 }
  0x9e   : > { %v234_v17 = vpop.xlane.xlu0 %233 }
  0x9f   : > { %v236_v18 = vmul.f32 0.00390625, %v234_v17 }
  0xa1   : > { %v252_v20 = vrot.slane %v236_v18, %v251_v16 }
  0xa3   : > { %v254_v21 = vsel %vm253_vm1, %v252_v20, %v247_v19 }
  0xa4   : > { %513 = vmatmul.mubr.msk.f32.vlgmr.msra.gmra.mxu0 %vm255_vm2, %v254_v21 }
 0x164   : > { %v324_v24 = vpop.f32.mrf.mxu0 }
 0x165   : > { %v325_v25 = vadd.f32 %v324_v24, %v239_v23 }
 0x166   : > { %v514_v26 = vpop.f32.mrf.mxu0 }
 0x167   : > { %v328_v27 = vmax.f32 %v325_v25, 0.0 }
 0x169   : > { %518 = vmatmul.mubr.msk.f32.vlgmr.msra.gmra.mxu1 %vm331_vm4, %v328_v27 }
 0x229   : > { %v405_v29 = vpop.f32.mrf.mxu1 }
 0x22a   : > { %v406_v30 = vadd.f32 %v405_v29, %v330_v28 }
 0x22b   : > { %v519_v31 = vpop.f32.mrf.mxu1 }
 0x22c   : > { %v409_v32 = vmul.f32 0.16666667, %v406_v30 }
 0x22e   : > { %v410_v33 = vadd.f32 0.5, %v409_v32 }
 0x230   : > { %v411_v34 = vmax.f32 %v410_v33, 0.0 }
 0x232   : > { %v412_v36 = vmin.f32 %v411_v34, 1.0 }
 0x234   : > { %v416_v37 = vrot.slane %v412_v36, %v415_v35 }
 0x236   : > { %418 = vbcast.lane.b32.xlu1 %v416_v37, 256 }
 0x23a   : > { %422 = vbcast.lane.b32.xlu1 %v416_v37, 264 }
 0x2a8   : > { %v419_v38 = vpop.permute.xlu1 %418 }
 0x2a9   : > { %v424_v39 = vmul.f32 %v419_v38, %v225_v0  ;;  %v425_v40 = vmul.f32 %v419_v38, %v226_v1 }
 0x2ab   : > { %428 = vst [vmem:[%s224_s11] sm:$0xff] %v424_v39  ;;  %429 = vst [vmem:[%s224_s11 + $0x8] sm:$0xff] %v425_v40 }
 0x2ac   : > { %v423_v41 = vpop.permute.xlu1 %422 }
 0x2ad   : > { %v426_v42 = vmul.f32 %v423_v41, %v227_v2  ;;  %v427_v43 = vmul.f32 %v423_v41, %v228_v4 }
 0x2af   : > { %430 = vst [vmem:[%s224_s11 + $0x10] sm:$0xff] %v426_v42  ;;  %431 = vst [vmem:[%s224_s11 + $0x18] sm:$0xff] %v427_v43 }
 0x2b0 PF: > { %s15_s18 = sadd.s32 1, %s536_s18  }
 0x2b1   : > { %p12_p4 = scmp.ge.s32.totalorder %s15_s18, 4  }
 0x2b3   :  { %14 = sbr.rel (!%p12_p4) target bundleno = 1 (0x1), region = 70 }

</bundles_post_ra>
